<compile_context>
chip_gen: v6e
topology: v6e:2x2x1
jax: 0.10.0
libtpu: 0.0.40
codegen_flags: <defaults>
</compile_context>

<pallas_src>
import jax
import jax.numpy as jnp
from jax import lax
from jax.experimental import pallas as pl
from jax.experimental.pallas import tpu as pltpu


_SIZING_BUDGET = 48 * 1024 * 1024      # conservative tile-sizing target (v7x: 64 MiB/TC)
_VMEM_CAP = 56 * 1024 * 1024           # never request the full physical VMEM
_W_RESIDENT_LIMIT = 16 * 1024 * 1024   # double-buffered resident W stays <= 32 MiB
_TB_CANDIDATES = (1024, 512, 256, 128, 64, 32, 16, 8)


def _round_up(x, m):
    return ((x + m - 1) // m) * m


def _choose_tb(batch, max_tb):
    """Adaptive batch tile: minimize padding waste, keep >=2 tiles for v7x."""
    if batch <= 8:
        return batch, batch                       # single full-extent block
    b8 = _round_up(batch, 8)
    cands = [t for t in _TB_CANDIDATES if t <= max_tb] or [8]
    tb = min(cands, key=lambda t: (_round_up(b8, t) - batch, -t))
    b_pad = _round_up(b8, tb)
    if b_pad // tb == 1 and tb >= 16:             # give both v7x TensorCores work
        tb //= 2
        b_pad = _round_up(b8, tb)
    return b_pad, tb


def prepare_params(weight, bias, *, compute_dtype=jnp.bfloat16, block_k=1024):
    """One-time parameter prep (hoisted out of the per-forward path).

    Pads the class dim to a lane-dense multiple of 128 with EXACT zeros (the
    kernel's mean/L2 reductions rely on padded logit columns being exactly 0
    before centering) and casts to the MXU compute dtype.
    """
    d, n = weight.shape
    n_pad = _round_up(n, 128)
    w_itemsize = jnp.dtype(compute_dtype).itemsize
    resident = d * n_pad * w_itemsize <= _W_RESIDENT_LIMIT

    if resident:
        d_pad, tk = d, None
    else:
        tk = block_k
        # shrink the K tile until the double-buffered weight slab is comfortable
        while tk > 128 and 2 * tk * n_pad * w_itemsize > _SIZING_BUDGET // 2:
            tk //= 2
        d_pad = _round_up(d, tk)

    if d_pad != d or n_pad != n:
        w_p = jnp.pad(weight, ((0, d_pad - d), (0, n_pad - n)))
    else:
        w_p = weight
    w_p = w_p.astype(compute_dtype)
    b_col = jnp.pad(bias, (0, n_pad - n)) if n_pad != n else bias
    b_p = b_col.reshape(1, n_pad).astype(jnp.float32)

    return dict(w=w_p, b=b_p, n_classes=n, d_orig=d,
                compute_dtype=jnp.dtype(compute_dtype), resident=resident,
                block_k=tk)


def _normalize_epilogue(logits, n_valid, n_pad):
    """Logit normalization on an f32 (TB, n_pad) tile.

    Invariant: padded class columns (>= n_valid) of `logits` are exactly zero
    (zero weight columns + zero bias entries), so the row sum over n_pad lanes
    equals the sum over the real classes.
    """
    inv_n = jnp.float32(1.0 / float(n_valid))
    mean = jnp.sum(logits, axis=-1, keepdims=True) * inv_n
    centered = logits - mean
    if n_valid != n_pad:
        lane = lax.broadcasted_iota(jnp.int32, centered.shape, 1)
        centered = jnp.where(lane < n_valid, centered, 0.0)
    ss = jnp.sum(centered * centered, axis=-1, keepdims=True)
    # rsqrt(max(ss, 1e-20)) == 1 / max(sqrt(ss), 1e-10)  (EUP op, no VALU divide)
    inv_norm = lax.rsqrt(jnp.maximum(ss, jnp.float32(1e-20)))
    return centered * inv_norm


def _make_resident_kernel(normalize_logits, n_valid, n_pad, compute_dtype):
    def kernel(x_ref, w_ref, b_ref, o_ref):
        # x streams from HBM as f32; cast on the VPU right before the MXU dot.
        logits = jnp.dot(x_ref[...].astype(compute_dtype), w_ref[...],
                         preferred_element_type=jnp.float32) + b_ref[...]
        if normalize_logits:
            logits = _normalize_epilogue(logits, n_valid, n_pad)
        o_ref[...] = logits.astype(o_ref.dtype)
    return kernel


def _make_ktiled_kernel(normalize_logits, n_valid, n_pad, compute_dtype):
    def kernel(x_ref, w_ref, b_ref, o_ref):
        k = pl.program_id(1)

        @pl.when(k == 0)
        def _():
            # o_ref's block index is constant across k -> resident accumulator;
            # initialize with the bias so the epilogue needs no extra add.
            o_ref[...] = jnp.broadcast_to(b_ref[...], o_ref.shape)

        o_ref[...] += jnp.dot(x_ref[...].astype(compute_dtype), w_ref[...],
                              preferred_element_type=jnp.float32)

        if normalize_logits:
            @pl.when(k == pl.num_programs(1) - 1)
            def _():
                o_ref[...] = _normalize_epilogue(o_ref[...], n_valid, n_pad)
    return kernel


def logit_normalization_forward(x_nchw, params, *, normalize_logits=True,
                                out_dtype=jnp.float32, return_padded=False):
    """Forward pass of LogitNormalizationWrapper with a flatten+linear `model`.

    x_nchw: [B, C, H, W] float32.  params: output of `prepare_params`.
    """
    w_p, b_p = params["w"], params["b"]
    n_classes, d_orig = params["n_classes"], params["d_orig"]
    compute_dtype, resident = params["compute_dtype"], params["resident"]
    d_pad, n_pad = w_p.shape

    batch = x_nchw.shape[0]
    x_flat = x_nchw.reshape(batch, -1)     # torch .view(B, -1) on NCHW row-major
    assert x_flat.shape[1] == d_orig

    w_itemsize = jnp.dtype(compute_dtype).itemsize
    out_dtype = jnp.dtype(out_dtype)

    if resident:
        # ---- weight-resident path: single grid axis over batch tiles --------
        w_vmem = 2 * d_pad * n_pad * w_itemsize            # double-buffered, fetched once
        per_row = 2 * d_pad * 4 + 2 * n_pad * out_dtype.itemsize
        max_tb = max(8, (_SIZING_BUDGET - w_vmem - (256 << 10)) // per_row)
        b_pad, tb = _choose_tb(batch, max_tb)

        kernel = _make_resident_kernel(normalize_logits, n_classes, n_pad, compute_dtype)
        grid = (b_pad // tb,)
        in_specs = [
            pl.BlockSpec((tb, d_pad), lambda b: (b, 0)),     # x tile (raw f32)
            pl.BlockSpec((d_pad, n_pad), lambda b: (0, 0)),  # W: constant block -> DMA'd once
            pl.BlockSpec((1, n_pad), lambda b: (0, 0)),      # bias
        ]
        out_specs = pl.BlockSpec((tb, n_pad), lambda b: (b, 0))
        dims = ("parallel",)
        pallas_out_dtype = out_dtype
        tile_vmem = w_vmem + tb * per_row + 2 * n_pad * 4
        w_hbm_reads = 1
    else:
        # ---- K-tiled fallback: weight too large to keep resident in VMEM ----
        tk = params["block_k"]
        w_slab = 2 * tk * n_pad * w_itemsize
        per_row = 2 * tk * 4 + 2 * n_pad * 4
        max_tb = max(8, (_SIZING_BUDGET - w_slab - (256 << 10)) // per_row)
        b_pad, tb = _choose_tb(batch, max_tb)

        kernel = _make_ktiled_kernel(normalize_logits, n_classes, n_pad, compute_dtype)
        grid = (b_pad // tb, d_pad // tk)                    # reduction axis last
        in_specs = [
            pl.BlockSpec((tb, tk), lambda b, k: (b, k)),
            pl.BlockSpec((tk, n_pad), lambda b, k: (k, 0)),
            pl.BlockSpec((1, n_pad), lambda b, k: (0, 0)),
        ]
        out_specs = pl.BlockSpec((tb, n_pad), lambda b, k: (b, 0))
        dims = ("parallel", "arbitrary")
        pallas_out_dtype = jnp.dtype(jnp.float32)            # f32 in-place accumulation
        tile_vmem = w_slab + tb * per_row + 2 * n_pad * 4
        w_hbm_reads = b_pad // tb

    # Pad x only when strictly required; the common case streams the f32
    # activations untouched (no extra HBM pad/cast pass).
    pad_b, pad_d = b_pad - batch, d_pad - d_orig
    x_in = x_flat if (pad_b == 0 and pad_d == 0) else jnp.pad(
        x_flat, ((0, pad_b), (0, pad_d)))

    vmem_limit = int(min(max(tile_vmem + (2 << 20), 4 << 20), _VMEM_CAP))
    cost = pl.CostEstimate(
        flops=2 * b_pad * d_pad * n_pad,
        transcendentals=b_pad if normalize_logits else 0,
        bytes_accessed=(b_pad * d_pad * 4
                        + w_hbm_reads * d_pad * n_pad * w_itemsize
                        + n_pad * 4
                        + b_pad * n_pad * pallas_out_dtype.itemsize),
    )

    out = pl.pallas_call(
        kernel,
        out_shape=jax.ShapeDtypeStruct((b_pad, n_pad), pallas_out_dtype),
        grid_spec=pltpu.PrefetchScalarGridSpec(
            num_scalar_prefetch=0,
            grid=grid,
            in_specs=in_specs,
            out_specs=out_specs,
        ),
        compiler_params=pltpu.CompilerParams(
            dimension_semantics=dims,
            vmem_limit_bytes=vmem_limit,
        ),
        cost_estimate=cost,
    )(x_in, w_p, b_p)

    if out.dtype != out_dtype:
        out = out.astype(out_dtype)           # only possible on the K-tiled path
    if return_padded:
        return out                            # (b_pad, n_pad); caller masks
    return out[:batch, :n_classes]


def _reference(x_nchw, weight, bias, normalize_logits=True, compute_dtype=None):
    batch = x_nchw.shape[0]
    x_flat = x_nchw.reshape(batch, -1)
    if compute_dtype is not None:
        x_flat = x_flat.astype(compute_dtype).astype(jnp.float32)
        weight = weight.astype(compute_dtype).astype(jnp.float32)
    out = x_flat @ weight + bias
    if normalize_logits:
        out = out - out.mean(axis=-1, keepdims=True)
        norms = jnp.linalg.norm(out, axis=-1, keepdims=True)
        norms = jnp.maximum(norms, 1e-10)
        out = out / norms
    return out


if __name__ == "__main__":
    key = jax.random.PRNGKey(0)
    kx, kw, kb = jax.random.split(key, 3)

    B, C, H, W = 2, 4, 16, 16
    NUM_CLASSES = 32
    D = C * H * W

    x = jax.random.normal(kx, (B, C, H, W), dtype=jnp.float32)
    weight = 0.02 * jax.random.normal(kw, (D, NUM_CLASSES), dtype=jnp.float32)
    bias = 0.01 * jax.random.normal(kb, (NUM_CLASSES,), dtype=jnp.float32)

    # f32 compute path: tight match vs float32 reference
    params_f32 = prepare_params(weight, bias, compute_dtype=jnp.float32)
    out_f32 = jax.block_until_ready(
        logit_normalization_forward(x, params_f32, normalize_logits=True))
    ref_f32 = _reference(x, weight, bias, normalize_logits=True)
    assert out_f32.shape == (B, NUM_CLASSES)
    assert jnp.allclose(out_f32, ref_f32, atol=1e-5, rtol=1e-5), "f32 mismatch"

    # default bf16-MXU path (weights prepared once; x cast in-kernel)
    params_bf16 = prepare_params(weight, bias)
    out_bf16 = jax.block_until_ready(
        logit_normalization_forward(x, params_bf16, normalize_logits=True))
    ref_bf16 = _reference(x, weight, bias, normalize_logits=True,
                          compute_dtype=jnp.bfloat16)
    assert jnp.allclose(out_bf16, ref_bf16, atol=2e-3, rtol=2e-3), "bf16 mismatch"

    # normalize_logits=False path
    out_plain = jax.block_until_ready(
        logit_normalization_forward(x, params_f32, normalize_logits=False))
    ref_plain = _reference(x, weight, bias, normalize_logits=False)
    assert jnp.allclose(out_plain, ref_plain, atol=1e-5, rtol=1e-5), "plain mismatch"

    print("KERNEL_OK")
</pallas_src>

<mosaic_0001>
module attributes {stable_mosaic.version = 11 : i64} {
  func.func @kernel(%arg0: i32, %arg1: memref<2x1024xf32, #tpu.memory_space<vmem>>, %arg2: memref<1024x128xf32, #tpu.memory_space<vmem>>, %arg3: memref<1x128xf32, #tpu.memory_space<vmem>>, %arg4: memref<2x128xf32, #tpu.memory_space<vmem>>) attributes {dimension_semantics = [#tpu.dimension_semantics<parallel>], iteration_bounds = array<i64: 1>, scalar_prefetch = 0 : i64, scratch_operands = 0 : i64, tpu.core_type = #tpu.core_type<tc>, window_params = [{transform_indices = @transform_0, window_bounds = array<i64: 2, 1024>}, {pipeline_mode = #tpu.pipeline_mode<synchronous>, transform_indices = @transform_1, window_bounds = array<i64: 1024, 128>}, {pipeline_mode = #tpu.pipeline_mode<synchronous>, transform_indices = @transform_2, window_bounds = array<i64: 1, 128>}, {transform_indices = @transform_3, window_bounds = array<i64: 2, 128>}]} {
    %c0 = arith.constant 0 : index
    %c0_0 = arith.constant 0 : index
    %0 = vector.load %arg1[%c0, %c0_0] : memref<2x1024xf32, #tpu.memory_space<vmem>>, vector<2x1024xf32>
    %c0_1 = arith.constant 0 : index
    %c0_2 = arith.constant 0 : index
    %1 = vector.load %arg2[%c0_1, %c0_2] : memref<1024x128xf32, #tpu.memory_space<vmem>>, vector<1024x128xf32>
    %cst = arith.constant dense<0.000000e+00> : vector<2x128xf32>
    %2 = tpu.matmul %0, %1, %cst {dimension_numbers = #tpu.dot_dimension_numbers<[1], [0], [0], [1], [0, 0, 1, 1], [], []>} : vector<2x1024xf32>, vector<1024x128xf32>, vector<2x128xf32> -> vector<2x128xf32>
    %c0_3 = arith.constant 0 : index
    %c0_4 = arith.constant 0 : index
    %3 = vector.load %arg3[%c0_3, %c0_4] : memref<1x128xf32, #tpu.memory_space<vmem>>, vector<1x128xf32>
    %4 = vector.broadcast %3 : vector<1x128xf32> to vector<2x128xf32>
    %5 = arith.addf %2, %4 : vector<2x128xf32>
    %cst_5 = arith.constant dense<0.000000e+00> : vector<2xf32>
    %6 = vector.multi_reduction <add>, %5, %cst_5 [1] : vector<2x128xf32> to vector<2xf32>
    %7 = vector.shape_cast %6 : vector<2xf32> to vector<2x1xf32>
    %cst_6 = arith.constant 3.125000e-02 : f32
    %8 = vector.broadcast %cst_6 : f32 to vector<2x1xf32>
    %9 = arith.mulf %7, %8 : vector<2x1xf32>
    %10 = vector.broadcast %9 : vector<2x1xf32> to vector<2x128xf32>
    %11 = arith.subf %5, %10 : vector<2x128xf32>
    %12 = tpu.iota {dimensions = array<i32: 1>} : vector<2x128xi32>
    %c32_i32 = arith.constant 32 : i32
    %13 = vector.broadcast %c32_i32 : i32 to vector<2x128xi32>
    %14 = arith.cmpi slt, %12, %13 : vector<2x128xi32>
    %cst_7 = arith.constant 0.000000e+00 : f32
    %15 = vector.broadcast %cst_7 : f32 to vector<2x128xf32>
    %16 = arith.select %14, %11, %15 : vector<2x128xi1>, vector<2x128xf32>
    %17 = arith.mulf %16, %16 : vector<2x128xf32>
    %cst_8 = arith.constant dense<0.000000e+00> : vector<2xf32>
    %18 = vector.multi_reduction <add>, %17, %cst_8 [1] : vector<2x128xf32> to vector<2xf32>
    %19 = vector.shape_cast %18 : vector<2xf32> to vector<2x1xf32>
    %cst_9 = arith.constant 9.99999968E-21 : f32
    %20 = vector.broadcast %cst_9 : f32 to vector<2x1xf32>
    %21 = arith.maximumf %19, %20 : vector<2x1xf32>
    %22 = math.rsqrt %21 : vector<2x1xf32>
    %23 = vector.broadcast %22 : vector<2x1xf32> to vector<2x128xf32>
    %24 = arith.mulf %16, %23 : vector<2x128xf32>
    %c0_10 = arith.constant 0 : index
    %c0_11 = arith.constant 0 : index
    %25 = vector.load %arg4[%c0_10, %c0_11] : memref<2x128xf32, #tpu.memory_space<vmem>>, vector<2x128xf32>
    tpu.vector_store %arg4[%c0_10, %c0_11], %24 {strides = array<i32>} : memref<2x128xf32, #tpu.memory_space<vmem>>, vector<2x128xf32>,
    return
  }
  func.func @transform_0(%arg0: i32) -> (i32, i32) {
    %c0_i32 = arith.constant 0 : i32
    %c0_i32_0 = arith.constant 0 : i32
    return %arg0, %c0_i32 : i32, i32
  }
  func.func @transform_1(%arg0: i32) -> (i32, i32) {
    %c0_i32 = arith.constant 0 : i32
    %c0_i32_0 = arith.constant 0 : i32
    %c0_i32_1 = arith.constant 0 : i32
    return %c0_i32, %c0_i32_0 : i32, i32
  }
  func.func @transform_2(%arg0: i32) -> (i32, i32) {
    %c0_i32 = arith.constant 0 : i32
    %c0_i32_0 = arith.constant 0 : i32
    %c0_i32_1 = arith.constant 0 : i32
    return %c0_i32, %c0_i32_0 : i32, i32
  }
  func.func @transform_3(%arg0: i32) -> (i32, i32) {
    %c0_i32 = arith.constant 0 : i32
    %c0_i32_0 = arith.constant 0 : i32
    return %arg0, %c0_i32 : i32, i32
  }
}

</mosaic_0001>

<bundles_post_ra>
// kernel: tpu_custom_call.1
= control target key start
LH: loop header
LB: loop body
LE: loop exit
PB: predicated region body
PF: predicated region fallthrough
CT: control target
= control target key end

     0   :  { %8 = vsyncpa [#allocation3], 0  ;;  %s799_s0 = inlined_call_operand.hbm [shape: f32[2,1024], index: 0, kind: input, shape index: {}]   ;;  %s800_s1 = inlined_call_operand.hbm [shape: f32[1024,128], index: 1, kind: input, shape index: {}]   ;;  %s801_s2 = inlined_call_operand.vmem [shape: f32[1,128], index: 2, kind: input, shape index: {}]   ;;  %s802_s3 = inlined_call_operand.hbm [shape: f32[2,128], index: 3, kind: output, shape index: {}]  }
   0x1   :  { %9 = vsyncpa [#allocation6], 0 }
   0x2   :  { %10 = vsyncpa [#allocation4], 0  ;;  %s753_s12 = smov [#allocation2]   ;;  %s754_s14 = smov [#allocation5]  }
   0x3   :  { %s17_s13 = sshll.u32 %s753_s12, 4  ;;  %s26_s15 = sshll.u32 %s754_s14, 4  ;;  %s18_s13 = int_to_ptr.vmem [resolvable:$true] %s17_s13  ;;  %s27_s15 = int_to_ptr.vmem [resolvable:$true] %s26_s15 }
   0x4   :  { %s695_s16 = scalar_lea.vmem %s18_s13, 256  ;;  %p700_p1 = scmp.lt.s32.totalorder %s18_s13, %s18_s13 }
   0x5   :  { %p696_p0 = scmp.ne.s32.totalorder %s18_s13, %s695_s16  ;;  %p701_p2 = scmp.lt.s32.totalorder %s695_s16, %s695_s16 }
   0x7   :  { %p702_p3 = por %p701_p2, %p700_p1 }
   0x9   :  { %p703_p4 = pnand %p702_p3, %p696_p0 }
   0xb   :  { %706 = shalt.err (!%p703_p4)
}
   0xc   :  { %20 = dma.hbm_to_vmem [thread:$0]  %s799_s0, 256, %s18_s13, [#allocation3]  }
   0xd   :  { %s715_s19 = scalar_lea.vmem %s27_s15, 16384  ;;  %p720_p6 = scmp.lt.s32.totalorder %s27_s15, %s27_s15 }
   0xe   :  { %p716_p5 = scmp.ne.s32.totalorder %s27_s15, %s715_s19  ;;  %p721_p7 = scmp.lt.s32.totalorder %s715_s19, %s715_s19 }
  0x10   :  { %p722_p8 = por %p721_p7, %p720_p6 }
  0x12   :  { %p723_p9 = pnand %p722_p8, %p716_p5 }
  0x14   :  { %726 = shalt.err (!%p723_p9)
}
  0x15   :  { %s755_s20 = smov 128   ;;  %s756_s21 = smov 8  }
  0x16   :  { %32 = dma.hbm_to_vmem [thread:$0]  %s800_s1, 16384, %s27_s15, [#allocation6], %s755_s20, %s755_s20, %s756_s21  }
  0x17   :  { %747 = dma.done.wait [#allocation3], 256  }
  0x18   :  { %748 = vsyncadd [#allocation3], 4294967040 }
  0x19   :  { %749 = dma.done.wait [#allocation6], 16384  }
  0x1a   :  { %750 = vsyncadd [#allocation6], 4294950912  ;;  %v74_v0 = vld [vmem:[#allocation5 + $0xf8] sm:$0xff]  ;;  %v73_v4 = vld [vmem:[#allocation5 + $0xf0] sm:$0xff]  ;;  %v757_v30 = vmov 1983009808   ;;  %v184_v32 = vlaneseq }
  0x1b   :  { %v106_v1 = vld [vmem:[#allocation5 + $0x1f8] sm:$0xff]  ;;  %537 = vmatprep.subr.mxu0 %v74_v0  ;;  %v105_v5 = vld [vmem:[#allocation5 + $0x1f0] sm:$0xff]  ;;  %v72_v8 = vld [vmem:[#allocation5 + $0xe8] sm:$0xff]  ;;  %v182_v31 = vunpack.c.l.s4 %v757_v30  ;;  %vm502_vm0 = vcmask 1041408  }
  0x1c   :  { %v58_v2 = vld [vmem:[#allocation5 + $0x78] sm:$0xff]  ;;  %572 = vmatprep.subr.mxu1 %v106_v1  ;;  %v57_v6 = vld [vmem:[#allocation5 + $0x70] sm:$0xff]  ;;  %v104_v9 = vld [vmem:[#allocation5 + $0x1e8] sm:$0xff]  ;;  %v185_v42 = vshrl.u32 %v184_v32, 7 }
  0x1d   :  { %v90_v3 = vld [vmem:[#allocation5 + $0x178] sm:$0xff]  ;;  %538 = vmatpush3.msra.mxu0 %v58_v2  ;;  %v89_v7 = vld [vmem:[#allocation5 + $0x170] sm:$0xff]  ;;  %v56_v10 = vld [vmem:[#allocation5 + $0x68] sm:$0xff]  ;;  %v183_v41 = vunpack.c.0.s8 %v182_v31 }
  0x1e   :  { %573 = vmatpush3.msra.mxu1 %v90_v3  ;;  %539 = vmatprep.subr.mxu0 %v73_v4  ;;  %v88_v11 = vld [vmem:[#allocation5 + $0x168] sm:$0xff]  ;;  %v71_v12 = vld [vmem:[#allocation5 + $0xe0] sm:$0xff]  ;;  %v70_v16 = vld [vmem:[#allocation5 + $0xd8] sm:$0xff] }
  0x1f   :  { %574 = vmatprep.subr.mxu1 %v105_v5  ;;  %540 = vmatpush3.msra.mxu0 %v57_v6  ;;  %v103_v13 = vld [vmem:[#allocation5 + $0x1e0] sm:$0xff]  ;;  %v102_v17 = vld [vmem:[#allocation5 + $0x1d8] sm:$0xff]  ;;  %v69_v20 = vld [vmem:[#allocation5 + $0xd0] sm:$0xff]  ;;  %v786_v51 = vsub.s32 %v183_v41, %v185_v42 }
  0x20   :  { %575 = vmatpush3.msra.mxu1 %v89_v7  ;;  %541 = vmatprep.subr.mxu0 %v72_v8  ;;  %v55_v14 = vld [vmem:[#allocation5 + $0x60] sm:$0xff]  ;;  %v54_v18 = vld [vmem:[#allocation5 + $0x58] sm:$0xff]  ;;  %v101_v21 = vld [vmem:[#allocation5 + $0x1d0] sm:$0xff] }
  0x21   :  { %576 = vmatprep.subr.mxu1 %v104_v9  ;;  %v87_v15 = vld [vmem:[#allocation5 + $0x160] sm:$0xff]  ;;  %542 = vmatpush3.msra.mxu0 %v56_v10  ;;  %v86_v19 = vld [vmem:[#allocation5 + $0x158] sm:$0xff]  ;;  %v53_v22 = vld [vmem:[#allocation5 + $0x50] sm:$0xff] }
  0x22   :  { %577 = vmatpush3.msra.mxu1 %v88_v11  ;;  %543 = vmatprep.subr.mxu0 %v71_v12  ;;  %v85_v23 = vld [vmem:[#allocation5 + $0x150] sm:$0xff]  ;;  %v68_v24 = vld [vmem:[#allocation5 + $0xc8] sm:$0xff]  ;;  %v67_v28 = vld [vmem:[#allocation5 + $0xc0] sm:$0xff] }
  0x23   :  { %578 = vmatprep.subr.mxu1 %v103_v13  ;;  %544 = vmatpush3.msra.mxu0 %v55_v14  ;;  %v100_v25 = vld [vmem:[#allocation5 + $0x1c8] sm:$0xff]  ;;  %v99_v29 = vld [vmem:[#allocation5 + $0x1c0] sm:$0xff]  ;;  %v66_v35 = vld [vmem:[#allocation5 + $0xb8] sm:$0xff] }
  0x24   :  { %579 = vmatpush3.msra.mxu1 %v87_v15  ;;  %545 = vmatprep.subr.mxu0 %v70_v16  ;;  %v52_v26 = vld [vmem:[#allocation5 + $0x48] sm:$0xff]  ;;  %v51_v33 = vld [vmem:[#allocation5 + $0x40] sm:$0xff]  ;;  %v98_v36 = vld [vmem:[#allocation5 + $0x1b8] sm:$0xff] }
  0x25   :  { %580 = vmatprep.subr.mxu1 %v102_v17  ;;  %546 = vmatpush3.msra.mxu0 %v54_v18  ;;  %v84_v27 = vld [vmem:[#allocation5 + $0x148] sm:$0xff]  ;;  %v83_v34 = vld [vmem:[#allocation5 + $0x140] sm:$0xff]  ;;  %v50_v37 = vld [vmem:[#allocation5 + $0x38] sm:$0xff] }
  0x26   :  { %581 = vmatpush3.msra.mxu1 %v86_v19  ;;  %547 = vmatprep.subr.mxu0 %v69_v20  ;;  %v82_v38 = vld [vmem:[#allocation5 + $0x138] sm:$0xff]  ;;  %v65_v39 = vld [vmem:[#allocation5 + $0xb0] sm:$0xff]  ;;  %v64_v45 = vld [vmem:[#allocation5 + $0xa8] sm:$0xff] }
  0x27   :  { %582 = vmatprep.subr.mxu1 %v101_v21  ;;  %548 = vmatpush3.msra.mxu0 %v53_v22  ;;  %v97_v40 = vld [vmem:[#allocation5 + $0x1b0] sm:$0xff]  ;;  %v96_v46 = vld [vmem:[#allocation5 + $0x1a8] sm:$0xff]  ;;  %v63_v49 = vld [vmem:[#allocation5 + $0xa0] sm:$0xff] }
  0x28   :  { %583 = vmatpush3.msra.mxu1 %v85_v23  ;;  %549 = vmatprep.subr.mxu0 %v68_v24  ;;  %v49_v43 = vld [vmem:[#allocation5 + $0x30] sm:$0xff]  ;;  %v48_v47 = vld [vmem:[#allocation5 + $0x28] sm:$0xff]  ;;  %v95_v50 = vld [vmem:[#allocation5 + $0x1a0] sm:$0xff] }
  0x29   :  { %584 = vmatprep.subr.mxu1 %v100_v25  ;;  %550 = vmatpush3.msra.mxu0 %v52_v26  ;;  %v81_v44 = vld [vmem:[#allocation5 + $0x130] sm:$0xff]  ;;  %v80_v48 = vld [vmem:[#allocation5 + $0x128] sm:$0xff]  ;;  %v47_v52 = vld [vmem:[#allocation5 + $0x20] sm:$0xff] }
  0x2a   :  { %585 = vmatpush3.msra.mxu1 %v84_v27  ;;  %551 = vmatprep.subr.mxu0 %v67_v28  ;;  %v79_v53 = vld [vmem:[#allocation5 + $0x120] sm:$0xff]  ;;  %v41_v54 = vld [vmem:[#allocation2] sm:$0xff]  ;;  %v62_v55 = vld [vmem:[#allocation5 + $0x98] sm:$0xff] }
  0x2b   :  { %586 = vmatprep.subr.mxu1 %v99_v29  ;;  %552 = vmatpush3.msra.mxu0 %v51_v33  ;;  %v94_v56 = vld [vmem:[#allocation5 + $0x198] sm:$0xff]  ;;  %v180_v57 = vcombine.high %v41_v54, %v41_v54  ;;  %v61_v60 = vld [vmem:[#allocation5 + $0x90] sm:$0xff]  ;;  %v187_v62 = vrot.slane %v41_v54, %v786_v51  ;;  %v60_v1 = vld [vmem:[#allocation5 + $0x88] sm:$0xff] }
  0x2c   :  { %587 = vmatpush3.msra.mxu1 %v83_v34  ;;  %553 = vmatprep.subr.mxu0 %v66_v35  ;;  %v46_v58 = vld [vmem:[#allocation5 + $0x18] sm:$0xff]  ;;  %v93_v61 = vld [vmem:[#allocation5 + $0x190] sm:$0xff]  ;;  %v92_v2 = vld [vmem:[#allocation5 + $0x188] sm:$0xff] }
  0x2d   :  { %588 = vmatprep.subr.mxu1 %v98_v36  ;;  %554 = vmatpush3.msra.mxu0 %v50_v37  ;;  %v78_v59 = vld [vmem:[#allocation5 + $0x118] sm:$0xff]  ;;  %v45_v63 = vld [vmem:[#allocation5 + $0x10] sm:$0xff]  ;;  %v194_v3 = vrot.slane %v180_v57, %v786_v51  ;;  %v44_v4 = vld [vmem:[#allocation5 + $0x8] sm:$0xff]  ;;  %v195_v8 = vcombine.high %v187_v62, %v187_v62 }
  0x2e   :  { %589 = vmatpush3.msra.mxu1 %v82_v38  ;;  %555 = vmatprep.subr.mxu0 %v65_v39  ;;  %v77_v0 = vld [vmem:[#allocation5 + $0x110] sm:$0xff]  ;;  %v76_v5 = vld [vmem:[#allocation5 + $0x108] sm:$0xff]  ;;  %v59_v6 = vld [vmem:[#allocation5 + $0x80] sm:$0xff] }
  0x2f   :  { %590 = vmatprep.subr.mxu1 %v97_v40  ;;  %556 = vmatpush3.msra.mxu0 %v49_v43  ;;  %v91_v7 = vld [vmem:[#allocation5 + $0x180] sm:$0xff]  ;;  %v196_v11 = vcombine.high %v194_v3, %v194_v3  ;;  %v138_v12 = vld [vmem:[#allocation5 + $0x2f8] sm:$0xff]  ;;  %v137_v16 = vld [vmem:[#allocation5 + $0x2f0] sm:$0xff] }
  0x30   :  { %591 = vmatpush3.msra.mxu1 %v81_v44  ;;  %557 = vmatprep.subr.mxu0 %v64_v45  ;;  %v43_v9 = vld [vmem:[#allocation5] sm:$0xff]  ;;  %v170_v13 = vld [vmem:[#allocation5 + $0x3f8] sm:$0xff]  ;;  %v169_v17 = vld [vmem:[#allocation5 + $0x3f0] sm:$0xff] }
  0x31   :  { %592 = vmatprep.subr.mxu1 %v96_v46  ;;  %558 = vmatpush3.msra.mxu0 %v48_v47  ;;  %v75_v10 = vld [vmem:[#allocation5 + $0x100] sm:$0xff]  ;;  %v122_v14 = vld [vmem:[#allocation5 + $0x278] sm:$0xff]  ;;  %v121_v18 = vld [vmem:[#allocation5 + $0x270] sm:$0xff] }
  0x32   :  { %593 = vmatpush3.msra.mxu1 %v80_v48  ;;  %559 = vmatprep.subr.mxu0 %v63_v49  ;;  %v154_v15 = vld [vmem:[#allocation5 + $0x378] sm:$0xff]  ;;  %v153_v19 = vld [vmem:[#allocation5 + $0x370] sm:$0xff]  ;;  %v136_v20 = vld [vmem:[#allocation5 + $0x2e8] sm:$0xff] }
  0x33   :  { %594 = vmatprep.subr.mxu1 %v95_v50  ;;  %560 = vmatpush3.msra.mxu0 %v47_v52  ;;  %v168_v21 = vld [vmem:[#allocation5 + $0x3e8] sm:$0xff]  ;;  %v135_v24 = vld [vmem:[#allocation5 + $0x2e0] sm:$0xff]  ;;  %v134_v28 = vld [vmem:[#allocation5 + $0x2d8] sm:$0xff] }
  0x34   :  { %595 = vmatpush3.msra.mxu1 %v79_v53  ;;  %561 = vmatprep.subr.mxu0 %v62_v55  ;;  %v120_v22 = vld [vmem:[#allocation5 + $0x268] sm:$0xff]  ;;  %v167_v25 = vld [vmem:[#allocation5 + $0x3e0] sm:$0xff]  ;;  %v166_v29 = vld [vmem:[#allocation5 + $0x3d8] sm:$0xff] }
  0x35   :  { %596 = vmatprep.subr.mxu1 %v94_v56  ;;  %562 = vmatpush3.msra.mxu0 %v46_v58  ;;  %v152_v23 = vld [vmem:[#allocation5 + $0x368] sm:$0xff]  ;;  %v119_v26 = vld [vmem:[#allocation5 + $0x260] sm:$0xff]  ;;  %v118_v30 = vld [vmem:[#allocation5 + $0x258] sm:$0xff] }
  0x36   :  { %597 = vmatpush3.msra.mxu1 %v78_v59  ;;  %563 = vmatprep.subr.mxu0 %v61_v60  ;;  %v151_v27 = vld [vmem:[#allocation5 + $0x360] sm:$0xff]  ;;  %v150_v31 = vld [vmem:[#allocation5 + $0x358] sm:$0xff]  ;;  %v133_v33 = vld [vmem:[#allocation5 + $0x2d0] sm:$0xff] }
  0x37   :  { %598 = vmatprep.subr.mxu1 %v93_v61  ;;  %564 = vmatpush3.msra.mxu0 %v45_v63  ;;  %v165_v34 = vld [vmem:[#allocation5 + $0x3d0] sm:$0xff]  ;;  %v132_v37 = vld [vmem:[#allocation5 + $0x2c8] sm:$0xff]  ;;  %v131_v41 = vld [vmem:[#allocation5 + $0x2c0] sm:$0xff] }
  0x38   :  { %599 = vmatpush3.msra.mxu1 %v77_v0  ;;  %565 = vmatprep.subr.mxu0 %v60_v1  ;;  %v117_v35 = vld [vmem:[#allocation5 + $0x250] sm:$0xff]  ;;  %v164_v38 = vld [vmem:[#allocation5 + $0x3c8] sm:$0xff]  ;;  %v163_v42 = vld [vmem:[#allocation5 + $0x3c0] sm:$0xff] }
  0x39   :  { %600 = vmatprep.subr.mxu1 %v92_v2  ;;  %566 = vmatpush3.msra.mxu0 %v44_v4  ;;  %v149_v36 = vld [vmem:[#allocation5 + $0x350] sm:$0xff]  ;;  %v116_v39 = vld [vmem:[#allocation5 + $0x248] sm:$0xff]  ;;  %v115_v43 = vld [vmem:[#allocation5 + $0x240] sm:$0xff] }
  0x3a   :  { %601 = vmatpush3.msra.mxu1 %v76_v5  ;;  %567 = vmatprep.subr.mxu0 %v59_v6  ;;  %v148_v40 = vld [vmem:[#allocation5 + $0x348] sm:$0xff]  ;;  %v147_v44 = vld [vmem:[#allocation5 + $0x340] sm:$0xff]  ;;  %v130_v45 = vld [vmem:[#allocation5 + $0x2b8] sm:$0xff] }
  0x3b   :  { %602 = vmatprep.subr.mxu1 %v91_v7  ;;  %568 = vmatpush3.msra.mxu0 %v43_v9  ;;  %v162_v46 = vld [vmem:[#allocation5 + $0x3b8] sm:$0xff]  ;;  %v129_v49 = vld [vmem:[#allocation5 + $0x2b0] sm:$0xff]  ;;  %v128_v54 = vld [vmem:[#allocation5 + $0x2a8] sm:$0xff] }
  0x3c   :  { %286 = vmatprep.mubr.f32.mxu0 %v195_v8  ;;  %603 = vmatpush3.msra.mxu1 %v75_v10  ;;  %v114_v47 = vld [vmem:[#allocation5 + $0x238] sm:$0xff]  ;;  %v161_v50 = vld [vmem:[#allocation5 + $0x3b0] sm:$0xff]  ;;  %v160_v55 = vld [vmem:[#allocation5 + $0x3a8] sm:$0xff] }
  0x3d   :  { %287 = vmatmul.mubr.f32.vlgmr.msra.gmra.mxu0 %v187_v62  ;;  %356 = vmatprep.mubr.f32.mxu1 %v196_v11  ;;  %v146_v48 = vld [vmem:[#allocation5 + $0x338] sm:$0xff]  ;;  %v113_v52 = vld [vmem:[#allocation5 + $0x230] sm:$0xff]  ;;  %v112_v57 = vld [vmem:[#allocation5 + $0x228] sm:$0xff] }
  0x3e   :  { %607 = vmatprep.subr.mxu0 %v138_v12  ;;  %642 = vmatprep.subr.mxu1 %v170_v13  ;;  %v145_v53 = vld [vmem:[#allocation5 + $0x330] sm:$0xff]  ;;  %v42_v56 = vld [vmem:[#allocation2 + $0x8] sm:$0xff]  ;;  %v144_v58 = vld [vmem:[#allocation5 + $0x328] sm:$0xff] }
  0x3f   :  { %357 = vmatmul.mubr.f32.vlgmr.msra.gmra.mxu1 %v194_v3  ;;  %608 = vmatpush3.msra.mxu0 %v122_v14  ;;  %v127_v59 = vld [vmem:[#allocation5 + $0x2a0] sm:$0xff]  ;;  %v197_v63 = vcombine.high %v42_v56, %v42_v56  ;;  %v126_v0 = vld [vmem:[#allocation5 + $0x298] sm:$0xff]  ;;  %v125_v4 = vld [vmem:[#allocation5 + $0x290] sm:$0xff]  ;;  %v204_v6 = vrot.slane %v42_v56, %v786_v51 }
  0x40   :  { %643 = vmatpush3.msra.mxu1 %v154_v15  ;;  %609 = vmatprep.subr.mxu0 %v137_v16  ;;  %v159_v60 = vld [vmem:[#allocation5 + $0x3a0] sm:$0xff]  ;;  %v158_v1 = vld [vmem:[#allocation5 + $0x398] sm:$0xff]  ;;  %v157_v5 = vld [vmem:[#allocation5 + $0x390] sm:$0xff] }
  0x41   :  { %644 = vmatprep.subr.mxu1 %v169_v17  ;;  %610 = vmatpush3.msra.mxu0 %v121_v18  ;;  %v111_v61 = vld [vmem:[#allocation5 + $0x220] sm:$0xff]  ;;  %v110_v2 = vld [vmem:[#allocation5 + $0x218] sm:$0xff]  ;;  %v109_v7 = vld [vmem:[#allocation5 + $0x210] sm:$0xff]  ;;  %v211_v9 = vrot.slane %v197_v63, %v786_v51  ;;  %v212_v16 = vcombine.high %v204_v6, %v204_v6 }
  0x42   :  { %645 = vmatpush3.msra.mxu1 %v153_v19  ;;  %611 = vmatprep.subr.mxu0 %v136_v20  ;;  %v143_v62 = vld [vmem:[#allocation5 + $0x320] sm:$0xff]  ;;  %v142_v3 = vld [vmem:[#allocation5 + $0x318] sm:$0xff]  ;;  %v141_v8 = vld [vmem:[#allocation5 + $0x310] sm:$0xff] }
  0x43   :  { %646 = vmatprep.subr.mxu1 %v168_v21  ;;  %612 = vmatpush3.msra.mxu0 %v120_v22  ;;  %v124_v10 = vld [vmem:[#allocation5 + $0x288] sm:$0xff]  ;;  %v123_v14 = vld [vmem:[#allocation5 + $0x280] sm:$0xff]  ;;  %v213_v18 = vcombine.high %v211_v9, %v211_v9 }
  0x44   :  { %647 = vmatpush3.msra.mxu1 %v152_v23  ;;  %613 = vmatprep.subr.mxu0 %v135_v24  ;;  %v156_v11 = vld [vmem:[#allocation5 + $0x388] sm:$0xff]  ;;  %v155_v15 = vld [vmem:[#allocation5 + $0x380] sm:$0xff]  ;;  %v536_v23 = vld [vmem:[%s801_s2] ss:$0 sm:$0xff]  ;;  %s758_s2 = smov [#allocation7]  }
  0x45   :  { %648 = vmatprep.subr.mxu1 %v167_v25  ;;  %614 = vmatpush3.msra.mxu0 %v119_v26  ;;  %v108_v12 = vld [vmem:[#allocation5 + $0x208] sm:$0xff]  ;;  %v107_v17 = vld [vmem:[#allocation5 + $0x200] sm:$0xff]  ;;  %s526_s24 = sshll.u32 %s758_s2, 4  ;;  %s527_s24 = int_to_ptr.vmem [resolvable:$true] %s526_s24 }
  0x46   :  { %649 = vmatpush3.msra.mxu1 %v151_v27  ;;  %615 = vmatprep.subr.mxu0 %v134_v28  ;;  %v140_v13 = vld [vmem:[#allocation5 + $0x308] sm:$0xff]  ;;  %v139_v51 = vld [vmem:[#allocation5 + $0x300] sm:$0xff]  ;;  %s727_s25 = scalar_lea.vmem %s527_s24, 32  ;;  %p732_p11 = scmp.lt.s32.totalorder %s527_s24, %s527_s24 }
  0x47   :  { %650 = vmatprep.subr.mxu1 %v166_v29  ;;  %616 = vmatpush3.msra.mxu0 %v118_v30  ;;  %p728_p10 = scmp.ne.s32.totalorder %s527_s24, %s727_s25  ;;  %p733_p12 = scmp.lt.s32.totalorder %s727_s25, %s727_s25 }
  0x48   :  { %651 = vmatpush3.msra.mxu1 %v150_v31  ;;  %617 = vmatprep.subr.mxu0 %v133_v33 }
  0x49   :  { %652 = vmatprep.subr.mxu1 %v165_v34  ;;  %618 = vmatpush3.msra.mxu0 %v117_v35  ;;  %p734_p13 = por %p733_p12, %p732_p11 }
  0x4a   :  { %653 = vmatpush3.msra.mxu1 %v149_v36  ;;  %619 = vmatprep.subr.mxu0 %v132_v37 }
  0x4b   :  { %654 = vmatprep.subr.mxu1 %v164_v38  ;;  %620 = vmatpush3.msra.mxu0 %v116_v39  ;;  %v509_v38 = vand.u32 127, %v184_v32  ;;  %p735_p0 = pnand %p734_p13, %p728_p10 }
  0x4c   :  { %655 = vmatpush3.msra.mxu1 %v148_v40  ;;  %621 = vmatprep.subr.mxu0 %v131_v41 }
  0x4d   :  { %656 = vmatprep.subr.mxu1 %v163_v42  ;;  %622 = vmatpush3.msra.mxu0 %v115_v43  ;;  %vm510_vm1 = vcmp.lt.s32.totalorder %v509_v38, 32 }
  0x4e   :  { %657 = vmatpush3.msra.mxu1 %v147_v44  ;;  %623 = vmatprep.subr.mxu0 %v130_v45 }
  0x4f   :  { %658 = vmatprep.subr.mxu1 %v162_v46  ;;  %624 = vmatpush3.msra.mxu0 %v114_v47 }
  0x50   :  { %659 = vmatpush3.msra.mxu1 %v146_v48  ;;  %625 = vmatprep.subr.mxu0 %v129_v49 }
  0x51   :  { %660 = vmatprep.subr.mxu1 %v161_v50  ;;  %626 = vmatpush3.msra.mxu0 %v113_v52 }
  0x52   :  { %661 = vmatpush3.msra.mxu1 %v145_v53  ;;  %627 = vmatprep.subr.mxu0 %v128_v54 }
  0x53   :  { %662 = vmatprep.subr.mxu1 %v160_v55  ;;  %628 = vmatpush3.msra.mxu0 %v112_v57 }
  0x54   :  { %663 = vmatpush3.msra.mxu1 %v144_v58  ;;  %629 = vmatprep.subr.mxu0 %v127_v59 }
  0x55   :  { %664 = vmatprep.subr.mxu1 %v159_v60  ;;  %630 = vmatpush3.msra.mxu0 %v111_v61 }
  0x56   :  { %665 = vmatpush3.msra.mxu1 %v143_v62  ;;  %631 = vmatprep.subr.mxu0 %v126_v0 }
  0x57   :  { %666 = vmatprep.subr.mxu1 %v158_v1  ;;  %632 = vmatpush3.msra.mxu0 %v110_v2 }
  0x58   :  { %667 = vmatpush3.msra.mxu1 %v142_v3  ;;  %633 = vmatprep.subr.mxu0 %v125_v4 }
  0x59   :  { %668 = vmatprep.subr.mxu1 %v157_v5  ;;  %634 = vmatpush3.msra.mxu0 %v109_v7 }
  0x5a   :  { %669 = vmatpush3.msra.mxu1 %v141_v8  ;;  %635 = vmatprep.subr.mxu0 %v124_v10 }
  0x5b   :  { %670 = vmatprep.subr.mxu1 %v156_v11  ;;  %636 = vmatpush3.msra.mxu0 %v108_v12 }
  0x5c   :  { %671 = vmatpush3.msra.mxu1 %v140_v13  ;;  %637 = vmatprep.subr.mxu0 %v123_v14 }
  0x5d   :  { %672 = vmatprep.subr.mxu1 %v155_v15  ;;  %638 = vmatpush3.msra.mxu0 %v107_v17 }
  0x5e   :  { %426 = vmatprep.mubr.f32.mxu0 %v212_v16  ;;  %673 = vmatpush3.msra.mxu1 %v139_v51 }
  0x5f   :  { %496 = vmatprep.mubr.f32.mxu1 %v213_v18  ;;  %427 = vmatmul.mubr.f32.vlgmr.msra.gmra.mxu0 %v204_v6 }
  0x60   :  { %497 = vmatmul.mubr.f32.vlgmr.msra.gmra.mxu1 %v211_v9 }
  0xfd   :  { %v569_v19 = vpop.f32.mrf.mxu0 }
  0xff   :  { %v604_v20 = vpop.f32.mrf.mxu1  ;;  %v570_v21 = vpop.f32.mrf.mxu0 }
 0x100   :  { %v571_v22 = vadd.f32 %v570_v21, %v569_v19 }
 0x101   :  { %v605_v24 = vpop.f32.mrf.mxu1 }
 0x102   :  { %v289_v25 = vadd.f32 %v571_v22, %v536_v23  ;;  %v606_v26 = vadd.f32 %v605_v24, %v604_v20 }
 0x104   :  { %v359_v31 = vadd.f32 %v606_v26, %v289_v25 }
 0x11f   :  { %v639_v27 = vpop.f32.mrf.mxu0 }
 0x120   :  { %v674_v28 = vpop.f32.mrf.mxu1 }
 0x121   :  { %v640_v29 = vpop.f32.mrf.mxu0 }
 0x122   :  { %v675_v30 = vpop.f32.mrf.mxu1  ;;  %v641_v33 = vadd.f32 %v640_v29, %v639_v27 }
 0x123   :  { %v676_v35 = vadd.f32 %v675_v30, %v674_v28 }
 0x124   :  { %v429_v34 = vadd.f32 %v641_v33, %v359_v31 }
 0x126   :  { %v499_v36 = vadd.f32 %v676_v35, %v429_v34 }
 0x128   :  { %v503_v37 = vsel %vm502_vm0, %v499_v36, 0.0 }
 0x129   :  { %504 = vadd.xlane.f32.xlu0 %v503_v37 }
 0x1b2   :  { %v505_v39 = vpop.xlane.xlu0 %504 }
 0x1b3   :  { %v506_v40 = vmul.f32 0.03125, %v505_v39 }
 0x1b5   :  { %v507_v41 = vsub.f32 %v499_v36, %v506_v40 }
 0x1b7   :  { %v511_v42 = vsel %vm510_vm1, %v507_v41, 0.0 }
 0x1b8   :  { %v512_v43 = vmul.f32 %v511_v42, %v511_v42 }
 0x1ba   :  { %v513_v44 = vsel %vm502_vm0, %v512_v43, 0.0 }
 0x1bb   :  { %514 = vadd.xlane.f32.xlu0 %v513_v44 }
 0x244   :  { %v515_v45 = vpop.xlane.xlu0 %514 }
 0x245   :  { %v516_v46 = vmax.f32 %v515_v45, 1e-20 }
 0x247   :  { %685 = vrsqrt.f32 %v516_v46 }
 0x254   :  { %v686_v47 = vpop.eup %685 }
 0x255   :  { %v518_v48 = vmul.f32 %v686_v47, %v511_v42 }
 0x257   :  { %519 = vst [vmem:[#allocation7] sm:$0x3] %v518_v48 }
 0x258   :  { %738 = shalt.err (!%p735_p0)
}
 0x259   :  { %529 = dma.vmem_to_hbm [thread:$0]  %s527_s24, 32, %s802_s3, [#allocation4]  }
 0x25a   :  { %751 = dma.done.wait [#allocation4], 32  }
 0x25b   :  { %752 = vsyncadd [#allocation4], 4294967264 }
 0x25c   :  { %533 = vsyncpa [#allocation3], 1 }
 0x25d   :  { %534 = vsyncpa [#allocation6], 1 }
 0x25e   :  { %535 = vsyncpa [#allocation4], 1 }

</bundles_post_ra>
